<compile_context>
chip_gen: v6e
topology: v6e:2x2x1
jax: 0.10.0
libtpu: 0.0.40
codegen_flags: <defaults>
</compile_context>

<pallas_src>
import functools
import math

import jax
import jax.numpy as jnp
from jax.experimental import pallas as pl
from jax.experimental.pallas import tpu as pltpu

LOG2PI = math.log(2.0 * math.pi)


# --------------------------------------------------------------------------
# kernel
# --------------------------------------------------------------------------
def vae_kernel(xy1_ref, eps_ref, w1_ref, w2mv_ref, wbig_ref, w2p_ref,
               out_ref, *, n_samples, hidden_dim, x_dim, out_dim, latent_dim):
    S, H, L, Dy = n_samples, hidden_dim, latent_dim, out_dim

    xy1 = xy1_ref[...]                                   # (B, dx+dy+1) bf16
    eps = eps_ref[...]                                   # (S*B, L)     f32
    B = xy1.shape[0]
    SB = S * B
    C = wbig_ref.shape[1] - (H + 1)                      # n_components

    # ---- fused first layer: mu/var/p branches + all layer-1 biases, 1 MXU op
    h = jnp.dot(xy1, w1_ref[...], preferred_element_type=jnp.float32)   # (B, 128+H+1)

    # ---- q(z|x,y): block-diagonal second layer; lane 127 carries the constant
    #      1 so row 127 of W2mv supplies [b2m | b2v].
    h_mv = jnp.maximum(h[:, :128], 0.0)                                  # (B, 128)
    mv = jnp.dot(h_mv.astype(jnp.bfloat16), w2mv_ref[...],
                 preferred_element_type=jnp.float32)                     # (B, 2L)
    mu = mv[:, :L]                                                       # (B, L)
    var = jnp.logaddexp(mv[:, L:], 0.0)                                  # softplus
    sd = jnp.sqrt(var)

    # p(y|x,z) layer-1 x-contribution (+ b1p); lane H carries the constant 1
    hx_p = h[:, 128:128 + H + 1]                                         # (B, H+1)

    # BCE targets: y lanes of the packed input (0/1 -> exact in bf16)
    y = xy1[:, x_dim:x_dim + Dy].astype(jnp.float32)                     # (B, Dy)

    # ---- tile batch rows to sample-major (S*B, .) with one broadcast+collapse
    def tile(a):
        return jnp.broadcast_to(a[None], (S,) + a.shape).reshape((SB,) + a.shape[1:])

    mu_sb, sd_sb, hx_p_sb, y_sb = tile(mu), tile(sd), tile(hx_p), tile(y)

    z = mu_sb + eps * sd_sb                                              # (SB, L)

    # ---- sum over rows of log q(z|x,y): (z-mu)^2/var == eps^2 exactly
    sum_eps2 = jnp.sum(eps * eps, keepdims=True)                         # (1,1)
    sum_log_var = jnp.sum(jnp.log(var), keepdims=True)                   # (1,1)
    log_q_sum = -0.5 * (SB * L * LOG2PI + sum_eps2) - 0.5 * S * sum_log_var

    # ---- one MXU op: p-net z-contribution AND mixture quadratic form (+const)
    ones = jnp.ones((SB, 1), jnp.float32)
    zc = jnp.concatenate([z * z, z, ones], axis=-1).astype(jnp.bfloat16)  # (SB, 2L+1)
    t = jnp.dot(zc, wbig_ref[...], preferred_element_type=jnp.float32)    # (SB, H+1+C)

    # p(y|x,z): relu( x@w1px + z@w1pz + b1p ); lane H stays exactly 1 -> b2p
    h_p = jnp.maximum(hx_p_sb + t[:, :H + 1], 0.0)                        # (SB, H+1)
    logits = jnp.dot(h_p.astype(jnp.bfloat16), w2p_ref[...],
                     preferred_element_type=jnp.float32)                  # (SB, Dy)

    bce = (jnp.maximum(logits, 0.0) - logits * y_sb
           + jnp.log1p(jnp.exp(-jnp.abs(logits))))
    log_p_y_sum = -jnp.sum(bce, keepdims=True)                            # (1,1)

    # mixture-of-Gaussians log prob: comp already includes log pi + constants
    comp = t[:, H + 1:H + 1 + C]                                          # (SB, C)
    m = jnp.max(comp, axis=-1, keepdims=True)
    log_p_z = m + jnp.log(jnp.sum(jnp.exp(comp - m), axis=-1, keepdims=True))
    log_p_z_sum = jnp.sum(log_p_z, keepdims=True)                         # (1,1)

    denom = jnp.float32(SB)
    kl = (log_q_sum - log_p_z_sum) / denom                                # (1,1)
    loss = kl - log_p_y_sum / denom                                       # (1,1) = -ELBO

    # ---- single lane-dense (B,128) output slab:
    #      lanes [0,Dy) = sample-0 logits, [0,Dy] = loss, [0,Dy+1] = kl
    logits0 = logits[:B, :]
    slab = jnp.concatenate(
        [logits0, jnp.zeros((B, 128 - Dy), jnp.float32)], axis=-1)        # (B, 128)
    rows = jax.lax.broadcasted_iota(jnp.int32, (B, 128), 0)
    lanes = jax.lax.broadcasted_iota(jnp.int32, (B, 128), 1)
    slab = jnp.where((rows == 0) & (lanes == Dy), loss, slab)
    slab = jnp.where((rows == 0) & (lanes == Dy + 1), kl, slab)
    out_ref[...] = slab


# --------------------------------------------------------------------------
# parameter fusion (run once per parameter update, NOT per step)
# --------------------------------------------------------------------------
def prepare_vae_operands(params):
    """Fold the 18 raw parameters into 4 padded bf16 weight slabs."""
    (w1mx, w1my, b1m, w2m, b2m,
     w1vx, w1vy, b1v, w2v, b2v,
     w1px, w1pz, b1p, w2p, b2p,
     logits_c, mu_c, logvar_c) = params
    dx, H = w1mx.shape
    dy = w1my.shape[0]
    L = w2m.shape[1]
    Dy = w2p.shape[1]
    C = mu_c.shape[0]
    assert 2 * H <= 126, "mu/var blocks + bias carrier must fit in one vreg"

    # fused first layer: rows [x | y | 1], cols [mu | var | pad | 1 | p | 1]
    K1, N1 = dx + dy + 1, 128 + H + 1
    W1 = jnp.zeros((K1, N1), jnp.float32)
    W1 = W1.at[:dx, 0:H].set(w1mx)
    W1 = W1.at[dx:dx + dy, 0:H].set(w1my)
    W1 = W1.at[K1 - 1, 0:H].set(b1m[0])
    W1 = W1.at[:dx, H:2 * H].set(w1vx)
    W1 = W1.at[dx:dx + dy, H:2 * H].set(w1vy)
    W1 = W1.at[K1 - 1, H:2 * H].set(b1v[0])
    W1 = W1.at[K1 - 1, 127].set(1.0)              # carrier -> W2mv bias row
    W1 = W1.at[:dx, 128:128 + H].set(w1px)
    W1 = W1.at[K1 - 1, 128:128 + H].set(b1p[0])
    W1 = W1.at[K1 - 1, 128 + H].set(1.0)          # carrier -> W2p bias row

    # block-diagonal GaussianMLP second layer, biases in row 127
    W2mv = jnp.zeros((128, 2 * L), jnp.float32)
    W2mv = W2mv.at[0:H, 0:L].set(w2m)
    W2mv = W2mv.at[H:2 * H, L:2 * L].set(w2v)
    W2mv = W2mv.at[127, 0:L].set(b2m[0])
    W2mv = W2mv.at[127, L:2 * L].set(b2v[0])

    # fused [z*z | z | 1] weight: p-net layer-1 z-part + mixture quad form
    log_pi = jax.nn.log_softmax(logits_c.reshape(-1))           # (C,)
    var_c = jax.nn.softplus(logvar_c)                           # (C, L)
    inv_var_c = 1.0 / var_c
    const_c = log_pi - 0.5 * (L * LOG2PI
                              + jnp.sum(jnp.log(var_c), axis=-1)
                              + jnp.sum(mu_c * mu_c * inv_var_c, axis=-1))
    Wb = jnp.zeros((2 * L + 1, H + 1 + C), jnp.float32)
    Wb = Wb.at[0:L, H + 1:].set((-0.5 * inv_var_c).T)           # z*z rows
    Wb = Wb.at[L:2 * L, 0:H].set(w1pz)                          # z rows -> p-net
    Wb = Wb.at[L:2 * L, H + 1:].set((mu_c * inv_var_c).T)
    Wb = Wb.at[2 * L, H + 1:].set(const_c)                      # ones row -> const
    # column H stays all-zero: pass-through for the h_p bias-carrier lane

    # p-net second layer, bias in row H
    W2p = jnp.zeros((H + 1, Dy), jnp.float32)
    W2p = W2p.at[0:H, :].set(w2p)
    W2p = W2p.at[H, :].set(b2p[0])

    bf16 = jnp.bfloat16
    return {'W1': W1.astype(bf16), 'W2mv': W2mv.astype(bf16),
            'Wb': Wb.astype(bf16), 'W2p': W2p.astype(bf16)}


# --------------------------------------------------------------------------
# forward wrapper (jit this; per-step work is one concat + one pallas_call)
# --------------------------------------------------------------------------
def vae_forward(x, y, eps, fused, *, n_samples):
    B, Dy = y.shape
    dx = x.shape[1]
    L = eps.shape[-1]
    S = n_samples
    H = fused['W2p'].shape[0] - 1

    xy1 = jnp.concatenate(
        [x, y, jnp.ones((B, 1), jnp.float32)], axis=1).astype(jnp.bfloat16)
    eps2d = eps.reshape(S * B, L).astype(jnp.float32)          # sample-major

    vmem = pl.BlockSpec(memory_space=pltpu.MemorySpace.VMEM)
    kernel = functools.partial(vae_kernel, n_samples=S, hidden_dim=H,
                               x_dim=dx, out_dim=Dy, latent_dim=L)
    slab = pl.pallas_call(
        kernel,
        out_shape=jax.ShapeDtypeStruct((B, 128), jnp.float32),
        in_specs=[vmem] * 6,
        out_specs=vmem,
    )(xy1, eps2d, fused['W1'], fused['W2mv'], fused['Wb'], fused['W2p'])

    return {'loss': slab[0, Dy], 'kl': slab[0, Dy + 1], 'logits': slab[:, :Dy]}


# --------------------------------------------------------------------------
# pure-JAX f32 reference mirroring the PyTorch forward
# --------------------------------------------------------------------------
def vae_reference(x, y, eps, params):
    (w1mx, w1my, b1m, w2m, b2m,
     w1vx, w1vy, b1v, w2v, b2v,
     w1px, w1pz, b1p, w2p, b2p,
     logits_c, mu_c, logvar_c) = params
    h_mu = jax.nn.relu(x @ w1mx + y @ w1my + b1m)
    mu = h_mu @ w2m + b2m
    h_lv = jax.nn.relu(x @ w1vx + y @ w1vy + b1v)
    var = jax.nn.softplus(h_lv @ w2v + b2v)
    sd = jnp.sqrt(var)
    z = mu[None] + eps * sd[None]                                # (S, B, L)
    log_q = jnp.sum(-0.5 * (LOG2PI + jnp.log(var)[None]
                            + (z - mu[None]) ** 2 / var[None]), axis=-1)
    h_p = jax.nn.relu(x[None] @ w1px + z @ w1pz + b1p)
    logits = h_p @ w2p + b2p                                     # (S, B, Dy)
    bce = (jnp.maximum(logits, 0.0) - logits * y[None]
           + jnp.log1p(jnp.exp(-jnp.abs(logits))))
    log_p_y = -jnp.sum(bce, axis=-1)
    log_pi = jax.nn.log_softmax(logits_c.reshape(-1))
    var_c = jax.nn.softplus(logvar_c)
    comp = jnp.sum(-0.5 * (LOG2PI + jnp.log(var_c)[None, None]
                           + (z[:, :, None, :] - mu_c[None, None]) ** 2
                           / var_c[None, None]), axis=-1)        # (S, B, C)
    log_p_z = jax.scipy.special.logsumexp(comp + log_pi[None, None, :], axis=-1)
    kl = jnp.mean(log_q - log_p_z)
    elbo = jnp.mean(log_p_y) - kl
    return {'loss': -elbo, 'kl': kl, 'logits': logits[0]}


def make_params(key, dx, dy, latent_dim, hidden_dim, n_components):
    ks = jax.random.split(key, 11)

    def lin_w(k, fi, fo):
        return jax.random.normal(k, (fi, fo), jnp.float32) / jnp.sqrt(jnp.float32(fi))

    def zeros(n):
        return jnp.zeros((1, n), jnp.float32)

    w1mx = lin_w(ks[0], dx, hidden_dim)
    w1my = lin_w(ks[1], dy, hidden_dim)
    b1m = zeros(hidden_dim)
    w2m = lin_w(ks[2], hidden_dim, latent_dim)
    b2m = zeros(latent_dim)

    w1vx = lin_w(ks[3], dx, hidden_dim)
    w1vy = lin_w(ks[4], dy, hidden_dim)
    b1v = zeros(hidden_dim)
    w2v = lin_w(ks[5], hidden_dim, latent_dim)
    b2v = zeros(latent_dim)

    w1px = lin_w(ks[6], dx, hidden_dim)
    w1pz = lin_w(ks[7], latent_dim, hidden_dim)
    b1p = zeros(hidden_dim)
    w2p = lin_w(ks[8], hidden_dim, dy)
    b2p = zeros(dy)

    logits_c = jnp.ones((1, n_components), jnp.float32)          # nn.Parameter(ones)
    xav = math.sqrt(2.0 / (n_components + latent_dim))           # xavier_normal_ std
    mu_c = jax.random.normal(ks[9], (n_components, latent_dim), jnp.float32) * xav
    logvar_c = jax.random.normal(ks[10], (n_components, latent_dim), jnp.float32) * xav

    return (w1mx, w1my, b1m, w2m, b2m,
            w1vx, w1vy, b1v, w2v, b2v,
            w1px, w1pz, b1p, w2p, b2p,
            logits_c, mu_c, logvar_c)


if __name__ == "__main__":
    input_dim = 8          # x has dimension 2*input_dim = 16
    output_dim = 16
    latent_dim = 16
    hidden_dim = 32        # hidden_dims = (32,)
    n_components = 4
    n_samples = 4
    batch = 8

    dx = 2 * input_dim
    key = jax.random.PRNGKey(0)
    kx, ky, keps, kp = jax.random.split(key, 4)

    x = jax.random.normal(kx, (batch, dx), jnp.float32)
    # y are BCE targets in [0, 1]
    y = (jax.random.uniform(ky, (batch, output_dim)) < 0.5).astype(jnp.float32)
    # eps replaces torch.randn in sample_z (drawn outside, passed in)
    eps = jax.random.normal(keps, (n_samples, batch, latent_dim), jnp.float32)

    params = make_params(kp, dx, output_dim, latent_dim, hidden_dim, n_components)

    fused = prepare_vae_operands(params)                 # hoisted: once per update
    fwd = jax.jit(functools.partial(vae_forward, n_samples=n_samples))

    out = jax.block_until_ready(fwd(x, y, eps, fused))
    ref = vae_reference(x, y, eps, params)

    # tolerances sized for bf16 MXU inputs vs. the pure-f32 reference
    assert out['logits'].shape == (batch, output_dim)
    assert jnp.allclose(out['loss'], ref['loss'], rtol=2e-2, atol=5e-2)
    assert jnp.allclose(out['kl'], ref['kl'], rtol=2e-2, atol=5e-2)
    assert jnp.allclose(out['logits'], ref['logits'], rtol=5e-2, atol=5e-2)

    print("KERNEL_OK")
</pallas_src>

<mosaic_0001>
module attributes {stable_mosaic.version = 11 : i64} {
  func.func @vae_kernel(%arg0: memref<8x33xbf16, #tpu.memory_space<vmem>>, %arg1: memref<32x16xf32, #tpu.memory_space<vmem>>, %arg2: memref<33x161xbf16, #tpu.memory_space<vmem>>, %arg3: memref<128x32xbf16, #tpu.memory_space<vmem>>, %arg4: memref<33x37xbf16, #tpu.memory_space<vmem>>, %arg5: memref<33x16xbf16, #tpu.memory_space<vmem>>, %arg6: memref<8x128xf32, #tpu.memory_space<vmem>>) attributes {dimension_semantics = [], scalar_prefetch = 0 : i64, scratch_operands = 0 : i64, tpu.core_type = #tpu.core_type<tc>} {
    %c0 = arith.constant 0 : index
    %c0_0 = arith.constant 0 : index
    %0 = vector.load %arg0[%c0, %c0_0] : memref<8x33xbf16, #tpu.memory_space<vmem>>, vector<8x33xbf16>
    %c0_1 = arith.constant 0 : index
    %c0_2 = arith.constant 0 : index
    %1 = vector.load %arg1[%c0_1, %c0_2] : memref<32x16xf32, #tpu.memory_space<vmem>>, vector<32x16xf32>
    %c0_3 = arith.constant 0 : index
    %c0_4 = arith.constant 0 : index
    %2 = vector.load %arg2[%c0_3, %c0_4] : memref<33x161xbf16, #tpu.memory_space<vmem>>, vector<33x161xbf16>
    %cst = arith.constant dense<0.000000e+00> : vector<8x161xf32>
    %3 = tpu.matmul %0, %2, %cst {dimension_numbers = #tpu.dot_dimension_numbers<[1], [0], [0], [1], [0, 0, 1, 1], [], []>} : vector<8x33xbf16>, vector<33x161xbf16>, vector<8x161xf32> -> vector<8x161xf32>
    %4 = vector.extract_strided_slice %3 {offsets = [0, 0], sizes = [8, 128], strides = [1, 1]} : vector<8x161xf32> to vector<8x128xf32>
    %cst_5 = arith.constant 0.000000e+00 : f32
    %5 = vector.broadcast %cst_5 : f32 to vector<8x128xf32>
    %6 = arith.maximumf %4, %5 : vector<8x128xf32>
    %7 = arith.truncf %6 : vector<8x128xf32> to vector<8x128xbf16>
    %c0_6 = arith.constant 0 : index
    %c0_7 = arith.constant 0 : index
    %8 = vector.load %arg3[%c0_6, %c0_7] : memref<128x32xbf16, #tpu.memory_space<vmem>>, vector<128x32xbf16>
    %cst_8 = arith.constant dense<0.000000e+00> : vector<8x32xf32>
    %9 = tpu.matmul %7, %8, %cst_8 {dimension_numbers = #tpu.dot_dimension_numbers<[1], [0], [0], [1], [0, 0, 1, 1], [], []>} : vector<8x128xbf16>, vector<128x32xbf16>, vector<8x32xf32> -> vector<8x32xf32>
    %10 = vector.extract_strided_slice %9 {offsets = [0, 0], sizes = [8, 16], strides = [1, 1]} : vector<8x32xf32> to vector<8x16xf32>
    %11 = vector.extract_strided_slice %9 {offsets = [0, 16], sizes = [8, 16], strides = [1, 1]} : vector<8x32xf32> to vector<8x16xf32>
    %cst_9 = arith.constant 0.000000e+00 : f32
    %12 = vector.broadcast %cst_9 : f32 to vector<8x16xf32>
    %13 = arith.maximumf %11, %12 : vector<8x16xf32>
    %14 = vector.broadcast %cst_9 : f32 to vector<8x16xf32>
    %15 = arith.subf %11, %14 : vector<8x16xf32>
    %16 = arith.cmpf one, %15, %15 : vector<8x16xf32>
    %17 = vector.broadcast %cst_9 : f32 to vector<8x16xf32>
    %18 = arith.addf %11, %17 : vector<8x16xf32>
    %19 = math.absf %15 : vector<8x16xf32>
    %cst_10 = arith.constant 0.000000e+00 : f32
    %20 = vector.broadcast %cst_10 : f32 to vector<8x16xf32>
    %21 = arith.subf %20, %19 : vector<8x16xf32>
    %22 = math.exp %21 : vector<8x16xf32>
    %23 = math.log1p %22 : vector<8x16xf32>
    %24 = arith.addf %13, %23 : vector<8x16xf32>
    %25 = arith.select %16, %18, %24 : vector<8x16xi1>, vector<8x16xf32>
    %26 = math.sqrt %25 : vector<8x16xf32>
    %27 = vector.extract_strided_slice %3 {offsets = [0, 128], sizes = [8, 33], strides = [1, 1]} : vector<8x161xf32> to vector<8x33xf32>
    %28 = vector.extract_strided_slice %0 {offsets = [0, 16], sizes = [8, 16], strides = [1, 1]} : vector<8x33xbf16> to vector<8x16xbf16>
    %29 = arith.extf %28 : vector<8x16xbf16> to vector<8x16xf32>
    %30 = vector.shape_cast %10 : vector<8x16xf32> to vector<1x8x16xf32>
    %31 = vector.shape_cast %30 : vector<1x8x16xf32> to vector<1x8x16xf32>
    %32 = vector.broadcast %31 : vector<1x8x16xf32> to vector<4x8x16xf32>
    %33 = vector.shape_cast %32 : vector<4x8x16xf32> to vector<32x16xf32>
    %34 = vector.shape_cast %26 : vector<8x16xf32> to vector<1x8x16xf32>
    %35 = vector.shape_cast %34 : vector<1x8x16xf32> to vector<1x8x16xf32>
    %36 = vector.broadcast %35 : vector<1x8x16xf32> to vector<4x8x16xf32>
    %37 = vector.shape_cast %36 : vector<4x8x16xf32> to vector<32x16xf32>
    %38 = vector.shape_cast %27 : vector<8x33xf32> to vector<1x8x33xf32>
    %39 = vector.shape_cast %38 : vector<1x8x33xf32> to vector<1x8x33xf32>
    %40 = vector.broadcast %39 : vector<1x8x33xf32> to vector<4x8x33xf32>
    %41 = vector.shape_cast %40 : vector<4x8x33xf32> to vector<32x33xf32>
    %42 = vector.shape_cast %29 : vector<8x16xf32> to vector<1x8x16xf32>
    %43 = vector.shape_cast %42 : vector<1x8x16xf32> to vector<1x8x16xf32>
    %44 = vector.broadcast %43 : vector<1x8x16xf32> to vector<4x8x16xf32>
    %45 = vector.shape_cast %44 : vector<4x8x16xf32> to vector<32x16xf32>
    %46 = arith.mulf %1, %37 : vector<32x16xf32>
    %47 = arith.addf %33, %46 : vector<32x16xf32>
    %48 = arith.mulf %1, %1 : vector<32x16xf32>
    %49 = vector.shape_cast %48 : vector<32x16xf32> to vector<1x32x16xf32>
    %cst_11 = arith.constant dense<0.000000e+00> : vector<1xf32>
    %50 = vector.multi_reduction <add>, %49, %cst_11 [1, 2] : vector<1x32x16xf32> to vector<1xf32>
    %51 = vector.shape_cast %50 : vector<1xf32> to vector<1x1x1xf32>
    %52 = vector.extract %51[0, 0, 0] : f32 from vector<1x1x1xf32>
    %53 = vector.broadcast %52 : f32 to vector<1x1xf32>
    %54 = math.log %25 : vector<8x16xf32>
    %55 = vector.shape_cast %54 : vector<8x16xf32> to vector<1x8x16xf32>
    %cst_12 = arith.constant dense<0.000000e+00> : vector<1xf32>
    %56 = vector.multi_reduction <add>, %55, %cst_12 [1, 2] : vector<1x8x16xf32> to vector<1xf32>
    %57 = vector.shape_cast %56 : vector<1xf32> to vector<1x1x1xf32>
    %58 = vector.extract %57[0, 0, 0] : f32 from vector<1x1x1xf32>
    %59 = vector.broadcast %58 : f32 to vector<1x1xf32>
    %cst_13 = arith.constant 940.993041 : f32
    %60 = vector.broadcast %cst_13 : f32 to vector<1x1xf32>
    %61 = arith.addf %60, %53 : vector<1x1xf32>
    %cst_14 = arith.constant -5.000000e-01 : f32
    %62 = vector.broadcast %cst_14 : f32 to vector<1x1xf32>
    %63 = arith.mulf %62, %61 : vector<1x1xf32>
    %cst_15 = arith.constant 2.000000e+00 : f32
    %64 = vector.broadcast %cst_15 : f32 to vector<1x1xf32>
    %65 = arith.mulf %64, %59 : vector<1x1xf32>
    %66 = arith.subf %63, %65 : vector<1x1xf32>
    %cst_16 = arith.constant 1.000000e+00 : f32
    %67 = vector.broadcast %cst_16 : f32 to vector<32x1xf32>
    %68 = arith.mulf %47, %47 : vector<32x16xf32>
    %69 = tpu.concatenate %68, %47, %67 in 1 : vector<32x16xf32>, vector<32x16xf32>, vector<32x1xf32> -> vector<32x33xf32>
    %70 = arith.truncf %69 : vector<32x33xf32> to vector<32x33xbf16>
    %c0_17 = arith.constant 0 : index
    %c0_18 = arith.constant 0 : index
    %71 = vector.load %arg4[%c0_17, %c0_18] : memref<33x37xbf16, #tpu.memory_space<vmem>>, vector<33x37xbf16>
    %cst_19 = arith.constant dense<0.000000e+00> : vector<32x37xf32>
    %72 = tpu.matmul %70, %71, %cst_19 {dimension_numbers = #tpu.dot_dimension_numbers<[1], [0], [0], [1], [0, 0, 1, 1], [], []>} : vector<32x33xbf16>, vector<33x37xbf16>, vector<32x37xf32> -> vector<32x37xf32>
    %73 = vector.extract_strided_slice %72 {offsets = [0, 0], sizes = [32, 33], strides = [1, 1]} : vector<32x37xf32> to vector<32x33xf32>
    %74 = arith.addf %41, %73 : vector<32x33xf32>
    %cst_20 = arith.constant 0.000000e+00 : f32
    %75 = vector.broadcast %cst_20 : f32 to vector<32x33xf32>
    %76 = arith.maximumf %74, %75 : vector<32x33xf32>
    %77 = arith.truncf %76 : vector<32x33xf32> to vector<32x33xbf16>
    %c0_21 = arith.constant 0 : index
    %c0_22 = arith.constant 0 : index
    %78 = vector.load %arg5[%c0_21, %c0_22] : memref<33x16xbf16, #tpu.memory_space<vmem>>, vector<33x16xbf16>
    %cst_23 = arith.constant dense<0.000000e+00> : vector<32x16xf32>
    %79 = tpu.matmul %77, %78, %cst_23 {dimension_numbers = #tpu.dot_dimension_numbers<[1], [0], [0], [1], [0, 0, 1, 1], [], []>} : vector<32x33xbf16>, vector<33x16xbf16>, vector<32x16xf32> -> vector<32x16xf32>
    %cst_24 = arith.constant 0.000000e+00 : f32
    %80 = vector.broadcast %cst_24 : f32 to vector<32x16xf32>
    %81 = arith.maximumf %79, %80 : vector<32x16xf32>
    %82 = arith.mulf %79, %45 : vector<32x16xf32>
    %83 = arith.subf %81, %82 : vector<32x16xf32>
    %84 = math.absf %79 : vector<32x16xf32>
    %cst_25 = arith.constant 0.000000e+00 : f32
    %85 = vector.broadcast %cst_25 : f32 to vector<32x16xf32>
    %86 = arith.subf %85, %84 : vector<32x16xf32>
    %87 = math.exp %86 : vector<32x16xf32>
    %88 = math.log1p %87 : vector<32x16xf32>
    %89 = arith.addf %83, %88 : vector<32x16xf32>
    %90 = vector.shape_cast %89 : vector<32x16xf32> to vector<1x32x16xf32>
    %cst_26 = arith.constant dense<0.000000e+00> : vector<1xf32>
    %91 = vector.multi_reduction <add>, %90, %cst_26 [1, 2] : vector<1x32x16xf32> to vector<1xf32>
    %92 = vector.shape_cast %91 : vector<1xf32> to vector<1x1x1xf32>
    %93 = vector.extract %92[0, 0, 0] : f32 from vector<1x1x1xf32>
    %94 = vector.broadcast %93 : f32 to vector<1x1xf32>
    %cst_27 = arith.constant 0.000000e+00 : f32
    %95 = vector.broadcast %cst_27 : f32 to vector<1x1xf32>
    %96 = arith.subf %95, %94 : vector<1x1xf32>
    %97 = vector.extract_strided_slice %72 {offsets = [0, 33], sizes = [32, 4], strides = [1, 1]} : vector<32x37xf32> to vector<32x4xf32>
    %cst_28 = arith.constant dense<0xFF800000> : vector<32xf32>
    %98 = vector.multi_reduction <maximumf>, %97, %cst_28 [1] : vector<32x4xf32> to vector<32xf32>
    %99 = vector.shape_cast %98 : vector<32xf32> to vector<32x1xf32>
    %100 = vector.broadcast %99 : vector<32x1xf32> to vector<32x4xf32>
    %101 = arith.subf %97, %100 : vector<32x4xf32>
    %102 = math.exp %101 : vector<32x4xf32>
    %cst_29 = arith.constant dense<0.000000e+00> : vector<32xf32>
    %103 = vector.multi_reduction <add>, %102, %cst_29 [1] : vector<32x4xf32> to vector<32xf32>
    %104 = vector.shape_cast %103 : vector<32xf32> to vector<32x1xf32>
    %105 = math.log %104 : vector<32x1xf32>
    %106 = arith.addf %99, %105 : vector<32x1xf32>
    %107 = vector.shape_cast %106 : vector<32x1xf32> to vector<1x32x1xf32>
    %cst_30 = arith.constant dense<0.000000e+00> : vector<1xf32>
    %108 = vector.multi_reduction <add>, %107, %cst_30 [1, 2] : vector<1x32x1xf32> to vector<1xf32>
    %109 = vector.shape_cast %108 : vector<1xf32> to vector<1x1x1xf32>
    %110 = vector.extract %109[0, 0, 0] : f32 from vector<1x1x1xf32>
    %111 = vector.broadcast %110 : f32 to vector<1x1xf32>
    %112 = arith.subf %66, %111 : vector<1x1xf32>
    %cst_31 = arith.constant 3.200000e+01 : f32
    %113 = vector.broadcast %cst_31 : f32 to vector<1x1xf32>
    %114 = arith.divf %112, %113 : vector<1x1xf32>
    %cst_32 = arith.constant 3.200000e+01 : f32
    %115 = vector.broadcast %cst_32 : f32 to vector<1x1xf32>
    %116 = arith.divf %96, %115 : vector<1x1xf32>
    %117 = arith.subf %114, %116 : vector<1x1xf32>
    %118 = vector.extract_strided_slice %79 {offsets = [0, 0], sizes = [8, 16], strides = [1, 1]} : vector<32x16xf32> to vector<8x16xf32>
    %cst_33 = arith.constant 0.000000e+00 : f32
    %119 = vector.broadcast %cst_33 : f32 to vector<8x112xf32>
    %120 = tpu.concatenate %118, %119 in 1 : vector<8x16xf32>, vector<8x112xf32> -> vector<8x128xf32>
    %121 = tpu.iota {dimensions = array<i32: 0>} : vector<8x128xi32>
    %122 = tpu.iota {dimensions = array<i32: 1>} : vector<8x128xi32>
    %c0_i32 = arith.constant 0 : i32
    %123 = vector.broadcast %c0_i32 : i32 to vector<8x128xi32>
    %124 = arith.cmpi eq, %121, %123 : vector<8x128xi32>
    %c16_i32 = arith.constant 16 : i32
    %125 = vector.broadcast %c16_i32 : i32 to vector<8x128xi32>
    %126 = arith.cmpi eq, %122, %125 : vector<8x128xi32>
    %127 = arith.andi %124, %126 : vector<8x128xi1>
    %128 = vector.shape_cast %117 : vector<1x1xf32> to vector<1x1xf32>
    %129 = vector.broadcast %128 : vector<1x1xf32> to vector<8x128xf32>
    %130 = arith.select %127, %129, %120 : vector<8x128xi1>, vector<8x128xf32>
    %c0_i32_34 = arith.constant 0 : i32
    %131 = vector.broadcast %c0_i32_34 : i32 to vector<8x128xi32>
    %132 = arith.cmpi eq, %121, %131 : vector<8x128xi32>
    %c17_i32 = arith.constant 17 : i32
    %133 = vector.broadcast %c17_i32 : i32 to vector<8x128xi32>
    %134 = arith.cmpi eq, %122, %133 : vector<8x128xi32>
    %135 = arith.andi %132, %134 : vector<8x128xi1>
    %136 = vector.shape_cast %114 : vector<1x1xf32> to vector<1x1xf32>
    %137 = vector.broadcast %136 : vector<1x1xf32> to vector<8x128xf32>
    %138 = arith.select %135, %137, %130 : vector<8x128xi1>, vector<8x128xf32>
    %c0_35 = arith.constant 0 : index
    %c0_36 = arith.constant 0 : index
    %139 = vector.load %arg6[%c0_35, %c0_36] : memref<8x128xf32, #tpu.memory_space<vmem>>, vector<8x128xf32>
    tpu.vector_store %arg6[%c0_35, %c0_36], %138 {strides = array<i32>} : memref<8x128xf32, #tpu.memory_space<vmem>>, vector<8x128xf32>,
    return
  }
}

</mosaic_0001>

<bundles_post_ra>
// kernel: vae_forward.1
= control target key start
LH: loop header
LB: loop body
LE: loop exit
PB: predicated region body
PF: predicated region fallthrough
CT: control target
= control target key end

     0   :  { %vm63_vm0 = vcmask 1040384   ;;  %v863_v1 = vmov 0   ;;  %v864_v3 = vmov 0.0   ;;  %vm59_vm1 = vcmask 269312   ;;  %s866_s26 = smov 112   ;;  %s1109_s2 = inlined_call_operand.vmem [shape: bf16[33,161], index: 2, kind: input, shape index: {}]   ;;  %s1110_s3 = inlined_call_operand.vmem [shape: bf16[128,32], index: 3, kind: input, shape index: {}]   ;;  %s1111_s0 = inlined_call_operand.vmem [shape: bf16[8,33], index: 0, kind: input, shape index: {}]   ;;  %s1112_s4 = inlined_call_operand.vmem [shape: bf16[33,37], index: 4, kind: input, shape index: {}]   ;;  %s1113_s1 = inlined_call_operand.vmem [shape: f32[32,16], index: 1, kind: input, shape index: {}]   ;;  %s1114_s5 = inlined_call_operand.vmem [shape: bf16[33,16], index: 5, kind: input, shape index: {}]   ;;  %s1115_s6 = inlined_call_operand.vmem [shape: f32[8,128], index: 6, kind: output, shape index: {}]  }
   0x1   :  { %v33_v0 = vld [vmem:[%s1109_s2 + $0x20] sm:$0x11]  ;;  %v907_v2 = vsel %vm63_vm0, 65535, %v863_v1  ;;  %104 = vmatprep.mubr.bf16.mxu0 %v863_v1  ;;  %737 = vmatprep.subr.bf16.mxu1 %v864_v3  ;;  %v803_v8 = vld [vmem:[%s1109_s2 + $0x14] ss:$8 sps:$4 sm:$0xff]   ;;  %v811_v14 = vld [vmem:[%s1110_s3 + $0x28] sm:$0xff]  }
   0x2   :  { %v698_v4 = vcombine.high %v33_v0, %v33_v0  ;;  %v697_v5 = vcombine.low %v33_v0, %v33_v0  ;;  %v809_v9 = vld [vmem:[%s1110_s3 + $0x38] sm:$0xff]   ;;  %v810_v11 = vld [vmem:[%s1110_s3 + $0x30] sm:$0xff]   ;;  %v806_v12 = vld [vmem:[%s1109_s2 + $0x4] ss:$8 sps:$4 sm:$0xff]   ;;  %vm865_vm2 = vmmov 0   ;;  %vm261_vm7 = vcmask 130048  }
   0x3   :  { %v805_v10 = vld [vmem:[%s1109_s2 + $0x10] ss:$8 sps:$4 sm:$0xff]   ;;  %738 = vmatpush3.bf16.msra.mxu1 %v809_v9  ;;  %v808_v13 = vld [vmem:[%s1109_s2] ss:$8 sps:$4 sm:$0xff]   ;;  %753 = vmatprep.mubr.msk.bf16.mxu1 %vm865_vm2, %v864_v3  ;;  %vm324_vm8 = vcmask 261120   ;;  %vm587_vm9 = vcmask 302344  }
   0x4   :  { %v70_v6 = vand.u32 %v698_v4, %v907_v2  ;;  %v67_v7 = vand.u32 %v697_v5, %v907_v2  ;;  %739 = vmatprep.subr.bf16.mxu1 %v864_v3  ;;  %v935_v15 = vld [vmem:[%s1111_s0] sm:$0xf]  ;;  %v813_v17 = vld [vmem:[%s1110_s3 + $0x18] sm:$0xff]   ;;  %v814_v18 = vld [vmem:[%s1110_s3 + $0x10] sm:$0xff]   ;;  %vm628_vm10 = vcmask 31744   ;;  %vm653_vm15 = vcmask 7168  }
   0x5   :  { %v812_v16 = vld [vmem:[%s1110_s3 + $0x20] sm:$0xff]   ;;  %v815_v19 = vld [vmem:[%s1110_s3 + $0x8] sm:$0xff]   ;;  %v817_v47 = vld [vmem:[%s1112_s4 + $0x10] ss:$0 sps:$4 sm:$0x11]  }
   0x6   :  { %82 = vmatprep.subr.bf16.mxu0 %v70_v6  ;;  %v816_v20 = vld [vmem:[%s1110_s3] sm:$0xff]   ;;  %v358_v50 = vand.u32 %v817_v47, %v907_v2  ;;  %v818_v51 = vld [vmem:[%s1112_s4 + $0x8] sm:$0xff]   ;;  %v988_v57 = vld [vmem:[%s1113_s1 + $0x10] sm:$0xff] }
   0x7   :  { %83 = vmatpush1.bf16.msra.mxu0 %v67_v7  ;;  %740 = vmatpush3.bf16.msra.mxu1 %v810_v11  ;;  %v819_v54 = vld [vmem:[%s1112_s4] sm:$0xff]   ;;  %v983_v56 = vld [vmem:[%s1113_s1 + $0x8] sm:$0xff]  ;;  %v993_v58 = vld [vmem:[%s1113_s1 + $0x18] sm:$0xff]  ;;  %s867_s4 = smov 16  }
   0x8   :  { %84 = vmatprep.subr.bf16.mxu0 %v803_v8  ;;  %741 = vmatprep.subr.bf16.mxu1 %v864_v3  ;;  %v978_v55 = vld [vmem:[%s1113_s1] sm:$0xff] }
   0xb   :  { %85 = vmatpush1.bf16.msra.mxu0 %v805_v10  ;;  %742 = vmatpush3.bf16.msra.mxu1 %v811_v14 }
   0xc   :  { %86 = vmatprep.subr.bf16.mxu0 %v806_v12  ;;  %743 = vmatprep.subr.bf16.mxu1 %v864_v3 }
   0xf   :  { %87 = vmatpush1.bf16.msra.mxu0 %v808_v13  ;;  %744 = vmatpush3.bf16.msra.mxu1 %v812_v16 }
  0x10   :  { %745 = vmatprep.subr.bf16.mxu1 %v864_v3  ;;  %757 = vmatprep.subr.bf16.mxu0 %v358_v50 }
  0x12   :  { %699 = vmatmul.mubr.msk.bf16.vlgmr.msra.gmra.mxu0 %vm59_vm1, %v935_v15 }
  0x13   :  { %746 = vmatpush3.bf16.msra.mxu1 %v813_v17  ;;  %758 = vmatpush3.bf16.msra.mxu0 %v358_v50 }
  0x14   :  { %747 = vmatprep.subr.bf16.mxu1 %v864_v3  ;;  %759 = vmatprep.subr.bf16.mxu0 %v818_v51 }
  0x17   :  { %748 = vmatpush3.bf16.msra.mxu1 %v814_v18  ;;  %760 = vmatpush3.bf16.msra.mxu0 %v818_v51 }
  0x18   :  { %749 = vmatprep.subr.bf16.mxu1 %v864_v3  ;;  %761 = vmatprep.subr.bf16.mxu0 %v819_v54 }
  0x1b   :  { %750 = vmatpush3.bf16.msra.mxu1 %v815_v19  ;;  %762 = vmatpush3.bf16.msra.mxu0 %v819_v54 }
  0x1c   :  { %751 = vmatprep.subr.bf16.mxu1 %v864_v3 }
  0x1f   :  { %752 = vmatpush3.bf16.msra.mxu1 %v816_v20 }
  0xd2   :  { %v106_v21 = vpop.f32.mrf.mxu0 }
  0xd3   :  { %v113_v22 = vmax.f32 %v106_v21, 0.0 }
  0xd4   :  { %v954_v23 = vpop.f32.mrf.mxu0 }
  0xd5   :  { %v114_v24 = vpack.c.bf16 %v113_v22, %v113_v22 }
  0xd6   :  { %v110_v25 = vpop.f32.mrf.mxu0 }
  0xd7   :  { %754 = vmatmul.mubr.bf16.vlgmr.msra.gmra.mxu1 %v114_v24 }
  0xd8   :  { %v111_v26 = vpop.f32.mrf.mxu0 }
 0x197   :  { %v213_v27 = vpop.f32.mrf.mxu1 }
 0x198   :  { %v222_v28 = vand.u32 2147483647, %v213_v27  ;;  %v219_v42 = vmax.f32 %v213_v27, 0.0  ;;  %vm220_vm4 = vcmp.ne.f32.partialorder %v213_v27, %v213_v27 }
 0x199   :  { %v755_v29 = vpop.f32.mrf.mxu1 }
 0x19a   :  { %v223_v30 = vsub.f32 0.0, %v222_v28  ;;  %v820_v29 = vld [vmem:[%s1114_s5 + $0x10] ss:$0 sps:$4 sm:$0x11]  }
 0x19b   :  { %v216_v31 = vpop.f32.mrf.mxu1 }
 0x19c   :  { %v224_v32 = vmul.f32 1.442695, %v223_v30  ;;  %v446_v30 = vand.u32 %v820_v29, %v907_v2  ;;  %v821_v31 = vld [vmem:[%s1114_s5 + $0x8] sm:$0xff]  }
 0x19d   :  { %v756_v33 = vpop.f32.mrf.mxu1 }
 0x19e   :  { %823 = vpow2.f32 %v224_v32  ;;  %767 = vmatprep.subr.bf16.mxu0 %v446_v30  ;;  %v822_v32 = vld [vmem:[%s1114_s5] sm:$0xff]   ;;  %s868_s5 = smov 95  }
 0x1ab   :  { %v824_v34 = vpop.eup %823 }
 0x1ac   :  { %v226_v35 = vadd.f32 1.0, %v824_v34  ;;  %v229_v36 = vmul.f32 -0.5, %v824_v34  ;;  %v232_v38 = vand.u32 2147483647, %v824_v34 }
 0x1ae   :  { %825 = vlog2.f32 %v226_v35  ;;  %v230_v37 = vadd.f32 1.0, %v229_v36  ;;  %vm233_vm3 = vcmp.lt.f32.partialorder %v232_v38, 0.0004427343 }
 0x1b0   :  { %v231_v41 = vmul.f32 %v824_v34, %v230_v37 }
 0x1bb   :  { %v826_v39 = vpop.eup %825 }
 0x1bc   :  { %v228_v40 = vmul.f32 0.6931472, %v826_v39 }
 0x1be   :  { %v234_v43 = vsel %vm233_vm3, %v231_v41, %v228_v40 }
 0x1bf   :  { %v235_v44 = vadd.f32 %v234_v43, %v219_v42 }
 0x1c1   :  { %v956_v45 = vsel %vm220_vm4, %v213_v27, %v235_v44 }
 0x1c2   :  { %827 = vrsqrt.f32 %v956_v45  ;;  %vm239_vm5 = vcmp.eq.f32.partialorder %v956_v45, inf  ;;  %v242_v49 = vand.u32 2147483648, %v956_v45  ;;  %vm241_vm6 = vcmp.eq.f32.partialorder %v956_v45, 0.0 }
 0x1cf   :  { %v828_v46 = vpop.eup %827 }
 0x1d0   :  { %v238_v48 = vmul.f32 %v828_v46, %v956_v45 }
 0x1d2   :  { %v240_v52 = vsel %vm239_vm5, %v956_v45, %v238_v48 }
 0x1d3   :  { %v243_v53 = vsel %vm241_vm6, %v242_v49, %v240_v52 }
 0x1d4   :  { %246 = vrot.lane.b32.xlu0 %v243_v53, %s866_s26 }
 0x246   :  { %v247_v59 = vpop.permute.xlu0 %246 }
 0x247   :  { %v249_v60 = vmul.f32 %v247_v59, %v978_v55  ;;  %v250_v61 = vmul.f32 %v247_v59, %v983_v56  ;;  %v251_v62 = vmul.f32 %v247_v59, %v988_v57  ;;  %v252_v63 = vmul.f32 %v247_v59, %v993_v58 }
 0x249   :  { %v255_v0 = vadd.f32 %v251_v62, %v213_v27  ;;  %v256_v1 = vadd.f32 %v252_v63, %v213_v27  ;;  %v253_v3 = vadd.f32 %v249_v60, %v213_v27  ;;  %v254_v4 = vadd.f32 %v250_v61, %v213_v27 }
 0x24b   :  { %v796_v5 = vpack.i.bf16 %v256_v1, %v255_v0  ;;  %v791_v6 = vpack.i.bf16 %v254_v4, %v253_v3  ;;  %v303_v8 = vmul.f32 %v256_v1, %v256_v1  ;;  %v302_v9 = vmul.f32 %v255_v0, %v255_v0 }
 0x24c   :  { %v301_v13 = vmul.f32 %v254_v4, %v254_v4  ;;  %v300_v14 = vmul.f32 %v253_v3, %v253_v3 }
 0x24d   :  { %797 = vrot.lane.b32.xlu1 %v796_v5, %s867_s4  ;;  %792 = vrot.lane.b32.xlu0 %v791_v6, %s867_s4 }
 0x2bf   :  { %v798_v7 = vpop.permute.xlu1 %797  ;;  %v793_v12 = vpop.permute.xlu0 %792 }
 0x2c0   :  { %v800_v10 = vunpack.i.h.bf16 %v798_v7  ;;  %v799_v11 = vunpack.i.l.bf16 %v798_v7  ;;  %v795_v16 = vunpack.i.h.bf16 %v793_v12  ;;  %v794_v17 = vunpack.i.l.bf16 %v793_v12 }
 0x2c2   :  { %v323_v18 = vsel %vm261_vm7, %v303_v8, %v800_v10  ;;  %v322_v19 = vsel %vm261_vm7, %v302_v9, %v799_v11  ;;  %v321_v22 = vsel %vm261_vm7, %v301_v13, %v795_v16  ;;  %v320_v24 = vsel %vm261_vm7, %v300_v14, %v794_v17 }
 0x2c3   :  { %v328_v20 = vsel %vm324_vm8, %v323_v18, 1.0  ;;  %v327_v21 = vsel %vm324_vm8, %v322_v19, 1.0  ;;  %v326_v26 = vsel %vm324_vm8, %v321_v22, 1.0  ;;  %v325_v27 = vsel %vm324_vm8, %v320_v24, 1.0 }
 0x2c4   :  { %v330_v25 = vpack.c.bf16 %v328_v20, %v327_v21  ;;  %v329_v28 = vpack.c.bf16 %v326_v26, %v325_v27  ;;  %v244_v18 = vunpack.c.l.bf16 %v935_v15  ;;  %v257_v19 = vmul.f32 %v978_v55, %v978_v55 }
 0x2c5   :  { %v259_v20 = vmul.f32 %v988_v57, %v988_v57 }
 0x2c6   :  { %763 = vmatprep.mubr.msk.bf16.mxu0 %vm59_vm1, %v329_v28  ;;  %v262_v21 = vsel %vm261_vm7, %v257_v19, 0.0 }
 0x2c7   :  { %764 = vmatmul.mubr.msk.bf16.vlgmr.msra.gmra.mxu0 %vm59_vm1, %v330_v25  ;;  %v260_v25 = vmul.f32 %v993_v58, %v993_v58  ;;  %v265_v15 = vsel %vm261_vm7, %v259_v20, 0.0 }
 0x2c8   :  { %768 = vmatpush3.bf16.msra.mxu0 %v446_v30 }
 0x2c9   :  { %769 = vmatprep.subr.bf16.mxu0 %v821_v31  ;;  %v267_v27 = vsel %vm261_vm7, %v260_v25, 0.0 }
 0x2cc   :  { %770 = vmatpush3.bf16.msra.mxu0 %v821_v31 }
 0x2cd   :  { %771 = vmatprep.subr.bf16.mxu0 %v822_v32 }
 0x2d0   :  { %772 = vmatpush3.bf16.msra.mxu0 %v822_v32 }
 0x387   :  { %v765_v33 = vpop.f32.mrf.mxu0 }
 0x388   :  { %v411_v38 = vadd.f32 %v765_v33, %v954_v23  ;;  %v594_v49 = vsel %vm587_vm9, %v765_v33, -inf }
 0x389   :  { %v394_v34 = vpop.f32.mrf.mxu0 }
 0x38a   :  { %v588_v35 = vsel %vm587_vm9, %v394_v34, -inf  ;;  %v409_v36 = vadd.f32 %v394_v34, %v954_v23  ;;  %v415_v47 = vmax.f32 %v411_v38, 0.0 }
 0x38b   :  { %589 = vmax.xlane.f32.xlu1 %v588_v35  ;;  %v766_v2 = vpop.f32.mrf.mxu0 }
 0x38c   :  { %v412_v37 = vadd.f32 %v766_v2, %v954_v23  ;;  %v597_v41 = vsel %vm587_vm9, %v766_v2, -inf  ;;  %v413_v44 = vmax.f32 %v409_v36, 0.0 }
 0x38d   :  { %v397_v39 = vpop.f32.mrf.mxu0 }
 0x38e   :  { %v410_v40 = vadd.f32 %v397_v39, %v954_v23  ;;  %v591_v42 = vsel %vm587_vm9, %v397_v39, -inf  ;;  %v416_v43 = vmax.f32 %v412_v37, 0.0 }
 0x38f   :  { %598 = vmax.xlane.f32.xlu1 %v597_v41  ;;  %592 = vmax.xlane.f32.xlu0 %v591_v42 }
 0x390   :  { %v414_v46 = vmax.f32 %v410_v40, 0.0  ;;  %v418_v50 = vpack.c.bf16 %v416_v43, %v415_v47 }
 0x392   :  { %v417_v48 = vpack.c.bf16 %v414_v46, %v413_v44 }
 0x393   :  { %595 = vmax.xlane.f32.xlu0 %v594_v49 }
 0x394   :  { %773 = vmatprep.mubr.msk.bf16.mxu0 %vm59_vm1, %v417_v48 }
 0x395   :  { %774 = vmatmul.mubr.msk.bf16.vlgmr.msra.gmra.mxu0 %vm59_vm1, %v418_v50 }
 0x414   :  { %v1029_v23 = vpop.xlane.xlu1 %589 }
 0x415   :  { %v600_v51 = vsub.f32 %v394_v34, %v1029_v23 }
 0x417   :  { %v604_v52 = vmul.f32 1.442695, %v600_v51 }
 0x418   :  { %v1032_v53 = vpop.xlane.xlu1 %598  ;;  %v1034_v54 = vpop.xlane.xlu0 %592 }
 0x419   :  { %829 = vpow2.f32 %v604_v52  ;;  %v603_v59 = vsub.f32 %v766_v2, %v1032_v53  ;;  %v601_v60 = vsub.f32 %v397_v39, %v1034_v54 }
 0x41b   :  { %v610_v61 = vmul.f32 1.442695, %v603_v59  ;;  %v606_v62 = vmul.f32 1.442695, %v601_v60 }
 0x41c   :  { %v1038_v63 = vpop.xlane.xlu0 %595 }
 0x41d   :  { %831 = vpow2.f32 %v610_v61  ;;  %v602_v0 = vsub.f32 %v765_v33, %v1038_v63 }
 0x41e   :  { %833 = vpow2.f32 %v606_v62 }
 0x41f   :  { %v608_v1 = vmul.f32 1.442695, %v602_v0 }
 0x421   :  { %835 = vpow2.f32 %v608_v1 }
 0x422   :  { %837 = vlog2.f32 %v956_v45  ;;  %v258_v45 = vmul.f32 %v983_v56, %v983_v56 }
 0x424   :  { %v263_v22 = vsel %vm261_vm7, %v258_v45, 0.0 }
 0x425   :  { %v264_v24 = vadd.f32 %v263_v22, %v262_v21 }
 0x426   :  { %v830_v3 = vpop.eup %829 }
 0x427   :  { %616 = vrot.lane.b32.xlu0 %v830_v3, %s868_s5  ;;  %v266_v26 = vadd.f32 %v265_v15, %v264_v24 }
 0x429   :  { %v268_v55 = vadd.f32 %v267_v27, %v266_v26 }
 0x42a   :  { %v832_v4 = vpop.eup %831 }
 0x42b   :  { %v834_v5 = vpop.eup %833  ;;  %622 = vrot.lane.b32.xlu0 %v832_v4, %s868_s5 }
 0x42c   :  { %618 = vrot.lane.b32.xlu1 %v834_v5, %s868_s5 }
 0x42e   :  { %v836_v6 = vpop.eup %835 }
 0x42f   :  { %v838_v16 = vpop.eup %837 }
 0x430   :  { %620 = vrot.lane.b32.xlu1 %v836_v6, %s868_s5  ;;  %v280_v17 = vmul.f32 0.6931472, %v838_v16 }
 0x455   :  { %v1057_v28 = vpop.f32.mrf.mxu0 }
 0x456   :  { %v515_v30 = vand.u32 2147483647, %v1057_v28 }
 0x457   :  { %v1059_v56 = vpop.f32.mrf.mxu0 }
 0x458   :  { %v513_v31 = vand.u32 2147483647, %v1059_v56  ;;  %v519_v32 = vsub.f32 0.0, %v515_v30 }
 0x459   :  { %v1061_v57 = vpop.f32.mrf.mxu0 }
 0x45a   :  { %v516_v33 = vand.u32 2147483647, %v1061_v57  ;;  %v517_v34 = vsub.f32 0.0, %v513_v31  ;;  %v525_v2 = vmul.f32 1.442695, %v519_v32 }
 0x45b   :  { %v1063_v29 = vpop.f32.mrf.mxu0 }
 0x45c   :  { %v514_v58 = vand.u32 2147483647, %v1063_v29  ;;  %v520_v36 = vsub.f32 0.0, %v516_v33  ;;  %v521_v37 = vmul.f32 1.442695, %v517_v34  ;;  %839 = vpow2.f32 %v525_v2 }
 0x45e   :  { %v518_v35 = vsub.f32 0.0, %v514_v58  ;;  %v527_v39 = vmul.f32 1.442695, %v520_v36  ;;  %841 = vpow2.f32 %v521_v37 }
 0x460   :  { %v523_v38 = vmul.f32 1.442695, %v518_v35 }
 0x462   :  { %843 = vpow2.f32 %v523_v38 }
 0x463   :  { %845 = vpow2.f32 %v527_v39 }
 0x469   :  { %v840_v40 = vpop.eup %839 }
 0x46a   :  { %v547_v43 = vadd.f32 1.0, %v840_v40  ;;  %v550_v60 = vmul.f32 -0.5, %v840_v40  ;;  %v553_v0 = vand.u32 2147483647, %v840_v40 }
 0x46b   :  { %v842_v41 = vpop.eup %841 }
 0x46c   :  { %v529_v46 = vadd.f32 1.0, %v842_v41  ;;  %847 = vlog2.f32 %v547_v43  ;;  %v532_v61 = vmul.f32 -0.5, %v842_v41  ;;  %v535_v3 = vand.u32 2147483647, %v842_v41 }
 0x46d   :  { %vm1077_vm11 = vcmp.lt.f32.partialorder %v553_v0, 0.0004427343 }
 0x46e   :  { %849 = vlog2.f32 %v529_v46  ;;  %vm1082_vm12 = vcmp.lt.f32.partialorder %v535_v3, 0.0004427343 }
 0x46f   :  { %v844_v42 = vpop.eup %843 }
 0x470   :  { %v1069_v44 = vpop.eup %845  ;;  %v538_v47 = vadd.f32 1.0, %v844_v42  ;;  %v541_v62 = vmul.f32 -0.5, %v844_v42 }
 0x471   :  { %v556_v48 = vadd.f32 1.0, %v1069_v44  ;;  %v559_v4 = vmul.f32 -0.5, %v1069_v44  ;;  %v562_v20 = vand.u32 2147483647, %v1069_v44 }
 0x472   :  { %851 = vlog2.f32 %v538_v47 }
 0x473   :  { %853 = vlog2.f32 %v556_v48  ;;  %v560_v45 = vadd.f32 1.0, %v559_v4  ;;  %vm563_vm14 = vcmp.lt.f32.partialorder %v562_v20, 0.0004427343 }
 0x479   :  { %v848_v1 = vpop.eup %847 }
 0x47a   :  { %v549_v25 = vmul.f32 0.6931472, %v848_v1 }
 0x47b   :  { %v850_v5 = vpop.eup %849 }
 0x47c   :  { %v531_v22 = vmul.f32 0.6931472, %v850_v5 }
 0x499   :  { %v617_v7 = vpop.permute.xlu0 %616 }
 0x49a   :  { %v629_v8 = vsel %vm628_vm10, %v617_v7, 0.0  ;;  %v551_v7 = vadd.f32 1.0, %v550_v60 }
 0x49b   :  { %630 = vadd.xlane.f32.xlu1 %v629_v8  ;;  %v852_v8 = vpop.eup %851 }
 0x49c   :  { %v540_v24 = vmul.f32 0.6931472, %v852_v8  ;;  %v552_v15 = vmul.f32 %v840_v40, %v551_v7 }
 0x49d   :  { %v623_v9 = vpop.permute.xlu0 %622 }
 0x49e   :  { %v619_v10 = vpop.permute.xlu1 %618  ;;  %v638_v11 = vsel %vm628_vm10, %v623_v9, 0.0  ;;  %v499_v9 = vmax.f32 %v1057_v28, 0.0 }
 0x49f   :  { %639 = vadd.xlane.f32.xlu1 %v638_v11  ;;  %v632_v14 = vsel %vm628_vm10, %v619_v10, 0.0  ;;  %v497_v10 = vmax.f32 %v1059_v56, 0.0  ;;  %v500_v11 = vmax.f32 %v1061_v57, 0.0 }
 0x4a2   :  { %v621_v12 = vpop.permute.xlu1 %620 }
 0x4a3   :  { %v635_v13 = vsel %vm628_vm10, %v621_v12, 0.0  ;;  %v533_v12 = vadd.f32 1.0, %v532_v61 }
 0x4a4   :  { %636 = vadd.xlane.f32.xlu0 %v635_v13  ;;  %v542_v13 = vadd.f32 1.0, %v541_v62 }
 0x4a5   :  { %v534_v31 = vmul.f32 %v842_v41, %v533_v12 }
 0x4a6   :  { %v543_v58 = vmul.f32 %v844_v42, %v542_v13 }
 0x4a7   :  { %v537_v37 = vsel %vm1082_vm12, %v534_v31, %v531_v22 }
 0x4a8   :  { %633 = vadd.xlane.f32.xlu0 %v632_v14  ;;  %v544_v14 = vand.u32 2147483647, %v844_v42 }
 0x4aa   :  { %vm545_vm13 = vcmp.lt.f32.partialorder %v544_v14, 0.0004427343 }
 0x4ab   :  { %v546_v38 = vsel %vm545_vm13, %v543_v58, %v540_v24 }
 0x4b0   :  { %282 = vrot.lane.b32.xlu1 %v280_v17, %s866_s26  ;;  %v854_v17 = vpop.eup %853 }
 0x4b1   :  { %v558_v32 = vmul.f32 0.6931472, %v854_v17 }
 0x4be   :  { %502 = vrot.lane.b32.xlu0 %v244_v18, %s866_s26  ;;  %v498_v18 = vmax.f32 %v1063_v29, 0.0 }
 0x4d4   :  { %269 = vadd.xlane.f32.xlu1 %v268_v55 }
 0x524   :  { %v631_v49 = vpop.xlane.xlu1 %630 }
 0x525   :  { %855 = vlog2.f32 %v631_v49 }
 0x528   :  { %v640_v50 = vpop.xlane.xlu1 %639 }
 0x52c   :  { %v283_v51 = vpop.permute.xlu1 %282 }
 0x52d   :  { %v637_v52 = vpop.xlane.xlu0 %636  ;;  %v285_v59 = vsel %vm261_vm7, %v283_v51, 0.0 }
 0x52e   :  { %857 = vlog2.f32 %v637_v52  ;;  %286 = vadd.xlane.f32.xlu0 %v285_v59 }
 0x52f   :  { %859 = vlog2.f32 %v640_v50 }
 0x531   :  { %v634_v6 = vpop.xlane.xlu0 %633 }
 0x532   :  { %861 = vlog2.f32 %v634_v6  ;;  %v856_v36 = vpop.eup %855 }
 0x533   :  { %v642_v43 = vmul.f32 0.6931472, %v856_v36 }
 0x535   :  { %v503_v21 = vpop.permute.xlu0 %502 }
 0x536   :  { %v505_v26 = vmul.f32 %v503_v21, %v1059_v56  ;;  %v506_v27 = vmul.f32 %v503_v21, %v1063_v29  ;;  %v507_v55 = vmul.f32 %v1057_v28, %v503_v21  ;;  %v508_v30 = vmul.f32 %v1061_v57, %v503_v21 }
 0x537   :  { %v555_v29 = vsel %vm1077_vm11, %v552_v15, %v549_v25  ;;  %v561_v28 = vmul.f32 %v1069_v44, %v560_v45  ;;  %v649_v44 = vadd.f32 %v642_v43, %v1029_v23 }
 0x538   :  { %v509_v33 = vsub.f32 %v497_v10, %v505_v26  ;;  %v510_v34 = vsub.f32 %v498_v18, %v506_v27  ;;  %v511_v35 = vsub.f32 %v499_v9, %v507_v55  ;;  %v512_v2 = vsub.f32 %v500_v11, %v508_v30 }
 0x539   :  { %v564_v42 = vsel %vm563_vm14, %v561_v28, %v558_v32  ;;  %v654_v6 = vsel %vm653_vm15, %v649_v44, 0.0 }
 0x53a   :  { %v565_v57 = vadd.f32 %v537_v37, %v509_v33  ;;  %v566_v39 = vadd.f32 %v546_v38, %v510_v34  ;;  %v567_v40 = vadd.f32 %v555_v29, %v511_v35  ;;  %v568_v46 = vadd.f32 %v564_v42, %v512_v2 }
 0x53b   :  { %v858_v41 = vpop.eup %857  ;;  %v677_v29 = vlaneseq }
 0x53c   :  { %v569_v47 = vsel %vm261_vm7, %v565_v57, 0.0  ;;  %v570_v48 = vsel %vm261_vm7, %v566_v39, 0.0  ;;  %v860_v49 = vpop.eup %859  ;;  %v646_v51 = vmul.f32 0.6931472, %v858_v41  ;;  %v572_v52 = vsel %vm261_vm7, %v567_v40, 0.0 }
 0x53d   :  { %v571_v50 = vadd.f32 %v570_v48, %v569_v47  ;;  %v648_v61 = vmul.f32 0.6931472, %v860_v49  ;;  %v574_v0 = vsel %vm261_vm7, %v568_v46, 0.0  ;;  %v678_v40 = vshrl.u32 %v677_v29, 7 }
 0x53e   :  { %v651_v3 = vadd.f32 %v646_v51, %v1038_v63  ;;  %v680_v41 = vand.u32 127, %v677_v29  ;;  %v676_v51 = vsel %vm261_vm7, %v1059_v56, 0.0 }
 0x53f   :  { %v862_v59 = vpop.eup %861  ;;  %v573_v60 = vadd.f32 %v572_v52, %v571_v50  ;;  %v652_v5 = vadd.f32 %v648_v61, %v1032_v53  ;;  %vm681_vm0 = vcmp.eq.s32.totalorder %v678_v40, 0 }
 0x540   :  { %v644_v62 = vmul.f32 0.6931472, %v862_v59  ;;  %v657_v9 = vsel %vm653_vm15, %v651_v3, 0.0  ;;  %vm682_vm1 = vcmp.eq.s32.totalorder %v680_v41, 16  ;;  %vm685_vm2 = vcmp.eq.s32.totalorder %v680_v41, 17 }
 0x541   :  { %v575_v1 = vadd.f32 %v574_v0, %v573_v60  ;;  %v659_v11 = vsel %vm653_vm15, %v652_v5, 0.0  ;;  %vm683_vm3 = vmand %vm681_vm0, %vm682_vm1 }
 0x542   :  { %v650_v4 = vadd.f32 %v644_v62, %v1034_v54  ;;  %vm686_vm4 = vmand %vm681_vm0, %vm685_vm2 }
 0x543   :  { %576 = vadd.xlane.f32.xlu0 %v575_v1 }
 0x544   :  { %v655_v7 = vsel %vm653_vm15, %v650_v4, 0.0 }
 0x545   :  { %v656_v8 = vadd.f32 %v655_v7, %v654_v6 }
 0x547   :  { %v658_v10 = vadd.f32 %v657_v9, %v656_v8 }
 0x549   :  { %v660_v23 = vadd.f32 %v659_v11, %v658_v10 }
 0x54b   :  { %661 = vadd.xlane.f32.xlu1 %v660_v23 }
 0x55d   :  { %v270_v12 = vpop.xlane.xlu1 %269 }
 0x55e   :  { %v271_v13 = vrot.slane %v270_v12, 4 }
 0x560   :  { %v272_v14 = vadd.f32 %v271_v13, %v270_v12 }
 0x562   :  { %v273_v16 = vrot.slane %v272_v14, 2 }
 0x564   :  { %v274_v17 = vadd.f32 %v273_v16, %v272_v14 }
 0x566   :  { %v275_v18 = vrot.slane %v274_v17, 1 }
 0x568   :  { %v276_v63 = vadd.f32 %v275_v18, %v274_v17 }
 0x56a   :  { %777 = vpush %v276_v63 }
 0x59b   :  { %s778_s17 = spop %777 }
 0x59c   :  { %v278_v36 = vstv %s778_s17 }
 0x59d   :  { %v296_v37 = vadd.f32 940.99304, %v278_v36 }
 0x59f   :  { %v297_v28 = vmul.f32 -0.5, %v296_v37 }
 0x5b7   :  { %v287_v54 = vpop.xlane.xlu0 %286 }
 0x5b8   :  { %v288_v19 = vrot.slane %v287_v54, 4 }
 0x5ba   :  { %v289_v45 = vadd.f32 %v288_v19, %v287_v54 }
 0x5bc   :  { %v290_v53 = vrot.slane %v289_v45, 2 }
 0x5be   :  { %v291_v20 = vadd.f32 %v290_v53, %v289_v45 }
 0x5c0   :  { %v292_v21 = vrot.slane %v291_v20, 1 }
 0x5c2   :  { %v293_v22 = vadd.f32 %v292_v21, %v291_v20 }
 0x5c4   :  { %779 = vpush %v293_v22 }
 0x5cc   :  { %v577_v24 = vpop.xlane.xlu0 %576 }
 0x5cd   :  { %v578_v25 = vrot.slane %v577_v24, 4 }
 0x5cf   :  { %v579_v15 = vadd.f32 %v578_v25, %v577_v24 }
 0x5d1   :  { %v580_v26 = vrot.slane %v579_v15, 2 }
 0x5d3   :  { %v581_v27 = vadd.f32 %v580_v26, %v579_v15 }
 0x5d4   :  { %v662_v55 = vpop.xlane.xlu1 %661 }
 0x5d5   :  { %v663_v30 = vrot.slane %v662_v55, 4  ;;  %v582_v31 = vrot.slane %v581_v27, 1 }
 0x5d7   :  { %v664_v58 = vadd.f32 %v663_v30, %v662_v55  ;;  %v583_v32 = vadd.f32 %v582_v31, %v581_v27 }
 0x5d9   :  { %v665_v33 = vrot.slane %v664_v58, 2  ;;  %781 = vpush %v583_v32 }
 0x5db   :  { %v666_v34 = vadd.f32 %v665_v33, %v664_v58 }
 0x5dd   :  { %v667_v35 = vrot.slane %v666_v34, 1 }
 0x5df   :  { %v668_v2 = vadd.f32 %v667_v35, %v666_v34 }
 0x5e1   :  { %783 = vpush %v668_v2 }
 0x5f5   :  { %s780_s18 = spop %779 }
 0x5f6   :  { %v295_v38 = vstv %s780_s18 }
 0x5f7   :  { %v298_v57 = vmul.f32 2.0, %v295_v38 }
 0x5f9   :  { %v299_v43 = vsub.f32 %v297_v28, %v298_v57 }
 0x60a   :  { %s782_s0 = spop %781 }
 0x60b   :  { %v585_v39 = vstv %s782_s0 }
 0x60c   :  { %v586_v42 = vsub.f32 0.0, %v585_v39 }
 0x60e   :  { %v674_v48 = vmul.f32 0.03125, %v586_v42 }
 0x612   :  { %s784_s19 = spop %783 }
 0x613   :  { %v670_v46 = vstv %s784_s19 }
 0x614   :  { %v671_v47 = vsub.f32 %v299_v43, %v670_v46 }
 0x616   :  { %v673_v49 = vmul.f32 0.03125, %v671_v47 }
 0x618   :  { %v675_v50 = vsub.f32 %v673_v49, %v674_v48 }
 0x61a   :  { %v684_v52 = vsel %vm683_vm3, %v675_v50, %v676_v51 }
 0x61b   :  { %v687_v59 = vsel %vm686_vm4, %v673_v49, %v684_v52 }
 0x61c   :  { %688 = vst [vmem:[%s1115_s6] sm:$0xff] %v687_v59 }

</bundles_post_ra>
